<compile_context>
chip_gen: v6e
topology: v6e:2x2x1
jax: 0.10.0
libtpu: 0.0.40
codegen_flags: <defaults>
</compile_context>

<pallas_src>
import jax
import jax.numpy as jnp
from jax.experimental import pallas as pl
from jax.experimental.pallas import tpu as pltpu

NUM_MACHINES = 4  # len(self.machines)


def _round_up(n, m):
    return ((n + m - 1) // m) * m


def bigmachine_kernel(w_ref, b_ref, c_ref, x_ref, o_ref):
    """fx = sum_i c[i] * tanh(w[i] * x + b[i]) for one (tile_rows, C) tile.

    w_ref, b_ref, c_ref : SMEM, shape (NUM_MACHINES,)  -- frozen params + coeffs
    x_ref, o_ref        : lane-dense VMEM tiles of the flattened input / output
    """
    x = x_ref[...].astype(jnp.float32)

    # Load all scalar triples up front (SMEM scalar reads), then build the
    # statically-unrolled 4-term expression.  mul/add ride the VPU slots,
    # tanh goes to the EUP (one push per machine).
    ws = [w_ref[i] for i in range(NUM_MACHINES)]
    bs = [b_ref[i] for i in range(NUM_MACHINES)]
    cs = [c_ref[i] for i in range(NUM_MACHINES)]

    acc = cs[0] * jnp.tanh(ws[0] * x + bs[0])
    for i in range(1, NUM_MACHINES):
        acc = acc + cs[i] * jnp.tanh(ws[i] * x + bs[i])

    o_ref[...] = acc.astype(o_ref.dtype)


def bigmachine_forward(x, w, b, c, *, lane_width=1024, max_tile_rows=1024):
    """Pallas-backed BigMachine.forward.

    x    : arbitrary-shaped tensor (e.g. NCHW), f32 or bf16
    w, b : (NUM_MACHINES,) frozen per-machine params
    c    : (NUM_MACHINES,) BigMachine.coeffs
    """
    orig_shape = x.shape
    n = x.size

    # ---- repack into a lane-dense slab (rows_padded, C), C % 128 == 0 ----
    C = lane_width
    assert C % 128 == 0, "lane width must be a multiple of 128"
    rows = max(1, (n + C - 1) // C)
    tile_rows = min(max_tile_rows, _round_up(rows, 8))   # multiple of 8
    rows_padded = _round_up(rows, tile_rows)
    padded_n = rows_padded * C

    flat = x.reshape(-1)
    if padded_n != n:
        flat = jnp.pad(flat, (0, padded_n - n))           # zero pad tail
    x2 = flat.reshape(rows_padded, C)

    grid = (rows_padded // tile_rows,)

    out2 = pl.pallas_call(
        bigmachine_kernel,
        out_shape=jax.ShapeDtypeStruct((rows_padded, C), x.dtype),
        grid=grid,
        in_specs=[
            pl.BlockSpec(memory_space=pltpu.MemorySpace.SMEM),   # w
            pl.BlockSpec(memory_space=pltpu.MemorySpace.SMEM),   # b
            pl.BlockSpec(memory_space=pltpu.MemorySpace.SMEM),   # coeffs
            pl.BlockSpec((tile_rows, C), lambda i: (i, 0)),      # x tile
        ],
        out_specs=pl.BlockSpec((tile_rows, C), lambda i: (i, 0)),
        compiler_params=pltpu.CompilerParams(
            dimension_semantics=("parallel",)                    # v7x: 2 TCs
        ),
    )(w, b, c, x2)

    # ---- slice padding back off and restore the original shape ----
    return out2.reshape(-1)[:n].reshape(orig_shape)


def bigmachine_reference(x, w, b, c):
    """Pure-JAX reference mirroring the PyTorch forward loop."""
    fx = jnp.zeros_like(x)
    for i in range(NUM_MACHINES):
        fx = fx + (c[i] * jnp.tanh(w[i] * x + b[i])).astype(x.dtype)
    return fx


if __name__ == "__main__":
    key = jax.random.PRNGKey(0)
    kx, kw, kb, kc = jax.random.split(key, 4)

    # Input consistent with an NCHW conv-style tensor: batch=2, channels=4, 16x16.
    x = jax.random.normal(kx, (2, 4, 16, 16), dtype=jnp.float32)

    # Deterministic frozen machine parameters and (non-zero, unlike the
    # torch.zeros init) coefficients so the kernel output is non-trivial.
    w = jax.random.normal(kw, (NUM_MACHINES,), dtype=jnp.float32)
    b = jax.random.normal(kb, (NUM_MACHINES,), dtype=jnp.float32)
    c = jax.random.normal(kc, (NUM_MACHINES,), dtype=jnp.float32)

    fx = jax.block_until_ready(bigmachine_forward(x, w, b, c))
    ref = bigmachine_reference(x, w, b, c)

    assert fx.shape == x.shape and fx.dtype == x.dtype
    assert jnp.allclose(fx, ref, atol=1e-5, rtol=1e-5), "mismatch vs reference"

    # Also exercise a non-tile-multiple shape to check the padding path.
    x_odd = jax.random.normal(kx, (3, 5, 7, 11), dtype=jnp.float32)
    fx_odd = jax.block_until_ready(bigmachine_forward(x_odd, w, b, c))
    assert jnp.allclose(fx_odd, bigmachine_reference(x_odd, w, b, c),
                        atol=1e-5, rtol=1e-5), "mismatch on padded shape"

    # TODO(synk): BigMachine.solve (torch.linalg.lstsq) is a host-side fit, not
    # part of the forward hot path, so it is intentionally not a Pallas kernel.
    print("KERNEL_OK")
</pallas_src>

<mosaic_0001>
module attributes {stable_mosaic.version = 11 : i64} {
  func.func @bigmachine_kernel(%arg0: i32, %arg1: memref<4xf32, #tpu.memory_space<smem>>, %arg2: memref<4xf32, #tpu.memory_space<smem>>, %arg3: memref<4xf32, #tpu.memory_space<smem>>, %arg4: memref<8x1024xf32, #tpu.memory_space<vmem>>, %arg5: memref<8x1024xf32, #tpu.memory_space<vmem>>) attributes {dimension_semantics = [#tpu.dimension_semantics<parallel>], iteration_bounds = array<i64: 1>, scalar_prefetch = 0 : i64, scratch_operands = 0 : i64, tpu.core_type = #tpu.core_type<tc>, window_params = [{transform_indices = @transform_0, window_bounds = array<i64: 4>}, {transform_indices = @transform_1, window_bounds = array<i64: 4>}, {transform_indices = @transform_2, window_bounds = array<i64: 4>}, {transform_indices = @transform_3, window_bounds = array<i64: 8, 1024>}, {transform_indices = @transform_4, window_bounds = array<i64: 8, 1024>}]} {
    %c0 = arith.constant 0 : index
    %c0_0 = arith.constant 0 : index
    %0 = vector.load %arg4[%c0, %c0_0] : memref<8x1024xf32, #tpu.memory_space<vmem>>, vector<8x1024xf32>
    %c0_1 = arith.constant 0 : index
    %1 = memref.load %arg1[%c0_1] : memref<4xf32, #tpu.memory_space<smem>>
    %c1 = arith.constant 1 : index
    %2 = memref.load %arg1[%c1] : memref<4xf32, #tpu.memory_space<smem>>
    %c2 = arith.constant 2 : index
    %3 = memref.load %arg1[%c2] : memref<4xf32, #tpu.memory_space<smem>>
    %c3 = arith.constant 3 : index
    %4 = memref.load %arg1[%c3] : memref<4xf32, #tpu.memory_space<smem>>
    %c0_2 = arith.constant 0 : index
    %5 = memref.load %arg2[%c0_2] : memref<4xf32, #tpu.memory_space<smem>>
    %c1_3 = arith.constant 1 : index
    %6 = memref.load %arg2[%c1_3] : memref<4xf32, #tpu.memory_space<smem>>
    %c2_4 = arith.constant 2 : index
    %7 = memref.load %arg2[%c2_4] : memref<4xf32, #tpu.memory_space<smem>>
    %c3_5 = arith.constant 3 : index
    %8 = memref.load %arg2[%c3_5] : memref<4xf32, #tpu.memory_space<smem>>
    %c0_6 = arith.constant 0 : index
    %9 = memref.load %arg3[%c0_6] : memref<4xf32, #tpu.memory_space<smem>>
    %c1_7 = arith.constant 1 : index
    %10 = memref.load %arg3[%c1_7] : memref<4xf32, #tpu.memory_space<smem>>
    %c2_8 = arith.constant 2 : index
    %11 = memref.load %arg3[%c2_8] : memref<4xf32, #tpu.memory_space<smem>>
    %c3_9 = arith.constant 3 : index
    %12 = memref.load %arg3[%c3_9] : memref<4xf32, #tpu.memory_space<smem>>
    %13 = vector.broadcast %1 : f32 to vector<8x1024xf32>
    %14 = arith.mulf %13, %0 : vector<8x1024xf32>
    %15 = vector.broadcast %5 : f32 to vector<8x1024xf32>
    %16 = arith.addf %14, %15 : vector<8x1024xf32>
    %17 = math.tanh %16 : vector<8x1024xf32>
    %18 = vector.broadcast %9 : f32 to vector<8x1024xf32>
    %19 = arith.mulf %18, %17 : vector<8x1024xf32>
    %20 = vector.broadcast %2 : f32 to vector<8x1024xf32>
    %21 = arith.mulf %20, %0 : vector<8x1024xf32>
    %22 = vector.broadcast %6 : f32 to vector<8x1024xf32>
    %23 = arith.addf %21, %22 : vector<8x1024xf32>
    %24 = math.tanh %23 : vector<8x1024xf32>
    %25 = vector.broadcast %10 : f32 to vector<8x1024xf32>
    %26 = arith.mulf %25, %24 : vector<8x1024xf32>
    %27 = arith.addf %19, %26 : vector<8x1024xf32>
    %28 = vector.broadcast %3 : f32 to vector<8x1024xf32>
    %29 = arith.mulf %28, %0 : vector<8x1024xf32>
    %30 = vector.broadcast %7 : f32 to vector<8x1024xf32>
    %31 = arith.addf %29, %30 : vector<8x1024xf32>
    %32 = math.tanh %31 : vector<8x1024xf32>
    %33 = vector.broadcast %11 : f32 to vector<8x1024xf32>
    %34 = arith.mulf %33, %32 : vector<8x1024xf32>
    %35 = arith.addf %27, %34 : vector<8x1024xf32>
    %36 = vector.broadcast %4 : f32 to vector<8x1024xf32>
    %37 = arith.mulf %36, %0 : vector<8x1024xf32>
    %38 = vector.broadcast %8 : f32 to vector<8x1024xf32>
    %39 = arith.addf %37, %38 : vector<8x1024xf32>
    %40 = math.tanh %39 : vector<8x1024xf32>
    %41 = vector.broadcast %12 : f32 to vector<8x1024xf32>
    %42 = arith.mulf %41, %40 : vector<8x1024xf32>
    %43 = arith.addf %35, %42 : vector<8x1024xf32>
    %c0_10 = arith.constant 0 : index
    %c0_11 = arith.constant 0 : index
    %44 = vector.load %arg5[%c0_10, %c0_11] : memref<8x1024xf32, #tpu.memory_space<vmem>>, vector<8x1024xf32>
    tpu.vector_store %arg5[%c0_10, %c0_11], %43 {strides = array<i32>} : memref<8x1024xf32, #tpu.memory_space<vmem>>, vector<8x1024xf32>,
    return
  }
  func.func @transform_0(%arg0: i32) -> i32 {
    %c0_i32 = arith.constant 0 : i32
    %c0_i32_0 = arith.constant 0 : i32
    return %c0_i32 : i32
  }
  func.func @transform_1(%arg0: i32) -> i32 {
    %c0_i32 = arith.constant 0 : i32
    %c0_i32_0 = arith.constant 0 : i32
    return %c0_i32 : i32
  }
  func.func @transform_2(%arg0: i32) -> i32 {
    %c0_i32 = arith.constant 0 : i32
    %c0_i32_0 = arith.constant 0 : i32
    return %c0_i32 : i32
  }
  func.func @transform_3(%arg0: i32) -> (i32, i32) {
    %c0_i32 = arith.constant 0 : i32
    %c0_i32_0 = arith.constant 0 : i32
    return %arg0, %c0_i32 : i32, i32
  }
  func.func @transform_4(%arg0: i32) -> (i32, i32) {
    %c0_i32 = arith.constant 0 : i32
    %c0_i32_0 = arith.constant 0 : i32
    return %arg0, %c0_i32 : i32, i32
  }
}

</mosaic_0001>

<bundles_post_ra>
// kernel: tpu_custom_call.1
= control target key start
LH: loop header
LB: loop body
LE: loop exit
PB: predicated region body
PF: predicated region fallthrough
CT: control target
= control target key end

     0   :  { %9 = vsyncpa [#allocation5], 0  ;;  %s612_s0 = inlined_call_operand.hbm [shape: f32[4], index: 0, kind: input, shape index: {}]   ;;  %s613_s1 = inlined_call_operand.vmem [shape: f32[4], index: 1, kind: input, shape index: {}]   ;;  %s614_s2 = inlined_call_operand.vmem [shape: f32[4], index: 2, kind: input, shape index: {}]   ;;  %s615_s3 = inlined_call_operand.hbm [shape: f32[8,1024], index: 3, kind: input, shape index: {}]   ;;  %s616_s4 = inlined_call_operand.hbm [shape: f32[8,1024], index: 4, kind: output, shape index: {}]  }
   0x1   :  { %10 = vsyncpa [#allocation6], 0 }
   0x2   :  { %11 = vsyncpa [#allocation9], 0 }
   0x3   :  { %12 = vsyncpa [#allocation3], 0 }
   0x4   :  { %13 = vsyncpa [#allocation4], 0  ;;  %s28_s17 = sshll.u32 %s613_s1, 4  ;;  %s435_s18 = smov [#allocation2]   ;;  %s29_s17 = int_to_ptr.vmem [resolvable:$true] %s28_s17 }
   0x5   :  { %21 = dma.hbm_to_smem %s612_s0, 16, %s435_s18, [#allocation5]  }
   0x6   :  { %s361_s21 = scalar_lea.vmem %s29_s17, 16  ;;  %p366_p1 = scmp.lt.s32.totalorder %s29_s17, %s29_s17 }
   0x7   :  { %p362_p0 = scmp.ne.s32.totalorder %s29_s17, %s361_s21  ;;  %p367_p2 = scmp.lt.s32.totalorder %s361_s21, %s361_s21 }
   0x9   :  { %p368_p3 = por %p367_p2, %p366_p1 }
   0xb   :  { %p369_p4 = pnand %p368_p3, %p362_p0 }
   0xd   :  { %372 = shalt.err (!%p369_p4)
}
   0xe   :  { %s436_s22 = smov [#allocation7]   ;;  %s38_s25 = sshll.u32 %s614_s2, 4  ;;  %s39_s25 = int_to_ptr.vmem [resolvable:$true] %s38_s25 }
   0xf   :  { %31 = dma.vmem_to_smem %s29_s17, 16, %s436_s22, [#allocation6]  }
  0x10   :  { %s373_s1 = scalar_lea.vmem %s39_s25, 16  ;;  %p378_p6 = scmp.lt.s32.totalorder %s39_s25, %s39_s25 }
  0x11   :  { %p374_p5 = scmp.ne.s32.totalorder %s39_s25, %s373_s1  ;;  %p379_p7 = scmp.lt.s32.totalorder %s373_s1, %s373_s1 }
  0x13   :  { %p380_p8 = por %p379_p7, %p378_p6 }
  0x15   :  { %p381_p9 = pnand %p380_p8, %p374_p5 }
  0x17   :  { %384 = shalt.err (!%p381_p9)
}
  0x18   :  { %s437_s0 = smov [#allocation8]   ;;  %s438_s26 = smov [#allocation10]  }
  0x19   :  { %41 = dma.vmem_to_smem %s39_s25, 16, %s437_s0, [#allocation9]  }
  0x1a   :  { %s48_s27 = sshll.u32 %s438_s26, 4  ;;  %s49_s27 = int_to_ptr.vmem [resolvable:$true] %s48_s27 }
  0x1b   :  { %s393_s28 = scalar_lea.vmem %s49_s27, 1024  ;;  %p398_p11 = scmp.lt.s32.totalorder %s49_s27, %s49_s27 }
  0x1c   :  { %p394_p10 = scmp.ne.s32.totalorder %s49_s27, %s393_s28  ;;  %p399_p12 = scmp.lt.s32.totalorder %s393_s28, %s393_s28 }
  0x1e   :  { %p400_p13 = por %p399_p12, %p398_p11 }
  0x20   :  { %p401_p0 = pnand %p400_p13, %p394_p10 }
  0x22   :  { %404 = shalt.err (!%p401_p0)
}
  0x23   :  { %51 = dma.hbm_to_vmem [thread:$0]  %s615_s3, 1024, %s49_s27, [#allocation3]  }
  0x24   :  { %425 = dma.done.wait [#allocation5], 16  }
  0x25   :  { %426 = vsyncadd [#allocation5], 4294967280 }
  0x26   :  { %427 = dma.done.wait [#allocation6], 16  }
  0x27   :  { %428 = vsyncadd [#allocation6], 4294967280 }
  0x28   :  { %429 = dma.done.wait [#allocation9], 16  }
  0x29   :  { %430 = vsyncadd [#allocation9], 4294967280 }
  0x2a   :  { %431 = dma.done.wait [#allocation3], 1024  }
  0x2b   :  { %432 = vsyncadd [#allocation3], 4294966272 }
  0x2c   :  { %64 = sfence }
  0x2d   :  { %s73_s30 = sld [smem:[#allocation2]]  ;;  %v65_v0 = vld [vmem:[#allocation10] sm:$0xff]  ;;  %v66_v2 = vld [vmem:[#allocation10 + $0x8] sm:$0xff]  ;;  %v67_v10 = vld [vmem:[#allocation10 + $0x10] sm:$0xff]  ;;  %s439_s15 = smov [#allocation11]  }
  0x2e   :  { %s275_s5 = sld [smem:[#allocation2 + $0x1]]  ;;  %v68_v24 = vld [vmem:[#allocation10 + $0x18] sm:$0xff]  ;;  %v69_v37 = vld [vmem:[#allocation10 + $0x20] sm:$0xff]  ;;  %v70_v41 = vld [vmem:[#allocation10 + $0x28] sm:$0xff]  ;;  %s263_s16 = sshll.u32 %s439_s15, 4  ;;  %s264_s16 = int_to_ptr.vmem [resolvable:$true] %s263_s16 }
  0x2f   :  { %s276_s6 = sld [smem:[#allocation2 + $0x2]]  ;;  %v71_v57 = vld [vmem:[#allocation10 + $0x30] sm:$0xff]  ;;  %s405_s17 = scalar_lea.vmem %s264_s16, 1024 }
  0x30   :  { %s277_s7 = sld [smem:[#allocation2 + $0x3]]  ;;  %p406_p1 = scmp.ne.s32.totalorder %s264_s16, %s405_s17 }
  0x31   :  { %s77_s8 = sld [smem:[#allocation7]]  ;;  %p410_p2 = scmp.lt.s32.totalorder %s264_s16, %s264_s16 }
  0x32   :  { %s278_s9 = sld [smem:[#allocation7 + $0x1]]  ;;  %p411_p3 = scmp.lt.s32.totalorder %s405_s17, %s405_s17 }
  0x33   :  { %s279_s10 = sld [smem:[#allocation7 + $0x2]]  ;;  %v477_v1 = vstv %s73_s30 }
  0x34   :  { %s280_s3 = sld [smem:[#allocation7 + $0x3]]  ;;  %v86_v3 = vmul.f32 %v477_v1, %v65_v0  ;;  %v480_v4 = vstv %s275_s5  ;;  %v87_v9 = vmul.f32 %v477_v1, %v66_v2  ;;  %v88_v20 = vmul.f32 %v477_v1, %v67_v10  ;;  %p412_p4 = por %p411_p3, %p410_p2 }
  0x35   :  { %v121_v5 = vmul.f32 %v480_v4, %v65_v0  ;;  %v483_v6 = vstv %s276_s6  ;;  %s489_s11 = sld [smem:[#allocation8]]  ;;  %v122_v13 = vmul.f32 %v480_v4, %v66_v2  ;;  %v123_v27 = vmul.f32 %v480_v4, %v67_v10 }
  0x36   :  { %v164_v7 = vmul.f32 %v483_v6, %v65_v0  ;;  %v486_v8 = vstv %s277_s7  ;;  %s495_s12 = sld [smem:[#allocation8 + $0x1]]  ;;  %v165_v16 = vmul.f32 %v483_v6, %v66_v2  ;;  %v166_v29 = vmul.f32 %v483_v6, %v67_v10  ;;  %p413_p5 = pnand %p412_p4, %p406_p1 }
  0x37   :  { %v491_v11 = vstv %s77_s8  ;;  %v207_v12 = vmul.f32 %v486_v8, %v65_v0  ;;  %v208_v19 = vmul.f32 %v486_v8, %v66_v2  ;;  %s510_s13 = sld [smem:[#allocation8 + $0x2]]  ;;  %v209_v31 = vmul.f32 %v486_v8, %v67_v10 }
  0x38   :  { %v95_v14 = vadd.f32 %v491_v11, %v86_v3  ;;  %v498_v15 = vstv %s278_s9  ;;  %v96_v23 = vadd.f32 %v491_v11, %v87_v9  ;;  %s515_s14 = sld [smem:[#allocation8 + $0x3]]  ;;  %v89_v32 = vmul.f32 %v477_v1, %v68_v24 }
  0x39   :  { %v130_v17 = vadd.f32 %v498_v15, %v121_v5  ;;  %v502_v18 = vstv %s279_s10  ;;  %v131_v26 = vadd.f32 %v498_v15, %v122_v13  ;;  %v97_v33 = vadd.f32 %v491_v11, %v88_v20  ;;  %v72_v20 = vld [vmem:[#allocation10 + $0x38] sm:$0xff] }
  0x3a   :  { %289 = vtanh.f32 %v95_v14  ;;  %v173_v21 = vadd.f32 %v502_v18, %v164_v7  ;;  %v507_v22 = vstv %s280_s3  ;;  %v174_v28 = vadd.f32 %v502_v18, %v165_v16 }
  0x3b   :  { %291 = vtanh.f32 %v130_v17  ;;  %v216_v25 = vadd.f32 %v507_v22, %v207_v12  ;;  %v217_v30 = vadd.f32 %v507_v22, %v208_v19  ;;  %v124_v34 = vmul.f32 %v480_v4, %v68_v24 }
  0x3c   :  { %293 = vtanh.f32 %v173_v21  ;;  %v525_v35 = vstv %s489_s11  ;;  %v132_v36 = vadd.f32 %v498_v15, %v123_v27  ;;  %v529_v38 = vstv %s495_s12 }
  0x3d   :  { %295 = vtanh.f32 %v216_v25  ;;  %v175_v39 = vadd.f32 %v502_v18, %v166_v29  ;;  %v167_v40 = vmul.f32 %v483_v6, %v68_v24  ;;  %v218_v42 = vadd.f32 %v507_v22, %v209_v31 }
  0x3e   :  { %297 = vtanh.f32 %v96_v23  ;;  %v98_v43 = vadd.f32 %v491_v11, %v89_v32  ;;  %v210_v44 = vmul.f32 %v486_v8, %v68_v24  ;;  %v133_v45 = vadd.f32 %v498_v15, %v124_v34 }
  0x3f   :  { %299 = vtanh.f32 %v131_v26  ;;  %v90_v46 = vmul.f32 %v477_v1, %v69_v37  ;;  %v125_v47 = vmul.f32 %v480_v4, %v69_v37  ;;  %v168_v48 = vmul.f32 %v483_v6, %v69_v37 }
  0x40   :  { %301 = vtanh.f32 %v174_v28  ;;  %v211_v49 = vmul.f32 %v486_v8, %v69_v37  ;;  %v91_v50 = vmul.f32 %v477_v1, %v70_v41  ;;  %v543_v51 = vstv %s510_s13 }
  0x41   :  { %303 = vtanh.f32 %v217_v30  ;;  %v546_v52 = vstv %s515_s14  ;;  %v176_v53 = vadd.f32 %v502_v18, %v167_v40  ;;  %v219_v54 = vadd.f32 %v507_v22, %v210_v44 }
  0x42   :  { %305 = vtanh.f32 %v97_v33  ;;  %v126_v55 = vmul.f32 %v480_v4, %v70_v41  ;;  %v169_v56 = vmul.f32 %v483_v6, %v70_v41  ;;  %v99_v58 = vadd.f32 %v491_v11, %v90_v46 }
  0x43   :  { %307 = vtanh.f32 %v132_v36  ;;  %v134_v59 = vadd.f32 %v498_v15, %v125_v47  ;;  %v212_v60 = vmul.f32 %v486_v8, %v70_v41  ;;  %v177_v62 = vadd.f32 %v502_v18, %v168_v48 }
  0x44   :  { %309 = vtanh.f32 %v175_v39  ;;  %v220_v63 = vadd.f32 %v507_v22, %v211_v49  ;;  %v100_v0 = vadd.f32 %v491_v11, %v91_v50  ;;  %v92_v5 = vmul.f32 %v477_v1, %v71_v57 }
  0x45   :  { %311 = vtanh.f32 %v218_v42  ;;  %v127_v7 = vmul.f32 %v480_v4, %v71_v57  ;;  %v135_v12 = vadd.f32 %v498_v15, %v126_v55  ;;  %v178_v13 = vadd.f32 %v502_v18, %v169_v56 }
  0x46   :  { %313 = vtanh.f32 %v98_v43  ;;  %v221_v17 = vadd.f32 %v507_v22, %v212_v60  ;;  %v170_v19 = vmul.f32 %v483_v6, %v71_v57  ;;  %v213_v25 = vmul.f32 %v486_v8, %v71_v57 }
  0x47   :  { %v290_v61 = vpop.eup %289  ;;  %315 = vtanh.f32 %v133_v45  ;;  %v101_v28 = vadd.f32 %v491_v11, %v92_v5  ;;  %v136_v29 = vadd.f32 %v498_v15, %v127_v7  ;;  %v93_v33 = vmul.f32 %v477_v1, %v72_v20 }
  0x48   :  { %v292_v2 = vpop.eup %291  ;;  %v112_v3 = vmul.f32 %v290_v61, %v525_v35  ;;  %317 = vtanh.f32 %v176_v53  ;;  %v179_v37 = vadd.f32 %v502_v18, %v170_v19  ;;  %v128_v39 = vmul.f32 %v480_v4, %v72_v20 }
  0x49   :  { %v294_v9 = vpop.eup %293  ;;  %v147_v10 = vmul.f32 %v292_v2, %v529_v38  ;;  %319 = vtanh.f32 %v219_v54  ;;  %v222_v1 = vadd.f32 %v507_v22, %v213_v25  ;;  %v171_v46 = vmul.f32 %v483_v6, %v72_v20 }
  0x4a   :  { %v296_v14 = vpop.eup %295  ;;  %v190_v16 = vmul.f32 %v294_v9, %v543_v51  ;;  %321 = vtanh.f32 %v99_v58  ;;  %v214_v4 = vmul.f32 %v486_v8, %v72_v20  ;;  %v102_v54 = vadd.f32 %v491_v11, %v93_v33 }
  0x4b   :  { %v298_v21 = vpop.eup %297  ;;  %v155_v23 = vadd.f32 %v147_v10, %v112_v3  ;;  %v233_v24 = vmul.f32 %v296_v14, %v546_v52  ;;  %323 = vtanh.f32 %v134_v59  ;;  %v137_v55 = vadd.f32 %v498_v15, %v128_v39 }
  0x4c   :  { %v300_v26 = vpop.eup %299  ;;  %v113_v27 = vmul.f32 %v298_v21, %v525_v35  ;;  %325 = vtanh.f32 %v177_v62  ;;  %v180_v8 = vadd.f32 %v502_v18, %v171_v46  ;;  %v223_v11 = vadd.f32 %v507_v22, %v214_v4 }
  0x4d   :  { %v302_v30 = vpop.eup %301  ;;  %v198_v31 = vadd.f32 %v190_v16, %v155_v23  ;;  %v148_v32 = vmul.f32 %v300_v26, %v529_v38  ;;  %327 = vtanh.f32 %v220_v63 }
  0x4e   :  { %v304_v34 = vpop.eup %303  ;;  %v191_v36 = vmul.f32 %v302_v30, %v543_v51  ;;  %329 = vtanh.f32 %v100_v0 }
  0x4f   :  { %v306_v40 = vpop.eup %305  ;;  %v241_v41 = vadd.f32 %v233_v24, %v198_v31  ;;  %v156_v42 = vadd.f32 %v148_v32, %v113_v27  ;;  %v234_v43 = vmul.f32 %v304_v34, %v546_v52  ;;  %331 = vtanh.f32 %v135_v12 }
  0x50   :  { %v308_v44 = vpop.eup %307  ;;  %v114_v45 = vmul.f32 %v306_v40, %v525_v35  ;;  %333 = vtanh.f32 %v178_v13 }
  0x51   :  { %v310_v47 = vpop.eup %309  ;;  %249 = vst [vmem:[#allocation11] sm:$0xff] %v241_v41  ;;  %v199_v48 = vadd.f32 %v191_v36, %v156_v42  ;;  %v149_v49 = vmul.f32 %v308_v44, %v529_v38  ;;  %335 = vtanh.f32 %v221_v17 }
  0x52   :  { %v312_v50 = vpop.eup %311  ;;  %v192_v53 = vmul.f32 %v310_v47, %v543_v51  ;;  %337 = vtanh.f32 %v101_v28 }
  0x53   :  { %v314_v56 = vpop.eup %313  ;;  %v242_v57 = vadd.f32 %v234_v43, %v199_v48  ;;  %v157_v58 = vadd.f32 %v149_v49, %v114_v45  ;;  %v235_v6 = vmul.f32 %v312_v50, %v546_v52  ;;  %339 = vtanh.f32 %v136_v29 }
  0x54   :  { %v316_v59 = vpop.eup %315  ;;  %v115_v60 = vmul.f32 %v314_v56, %v525_v35  ;;  %341 = vtanh.f32 %v179_v37 }
  0x55   :  { %v318_v61 = vpop.eup %317  ;;  %250 = vst [vmem:[#allocation11 + $0x8] sm:$0xff] %v242_v57  ;;  %v200_v62 = vadd.f32 %v192_v53, %v157_v58  ;;  %v150_v63 = vmul.f32 %v316_v59, %v529_v38  ;;  %343 = vtanh.f32 %v222_v1 }
  0x56   :  { %v320_v15 = vpop.eup %319  ;;  %v193_v0 = vmul.f32 %v318_v61, %v543_v51  ;;  %345 = vtanh.f32 %v102_v54 }
  0x57   :  { %v322_v2 = vpop.eup %321  ;;  %v243_v3 = vadd.f32 %v235_v6, %v200_v62  ;;  %v158_v5 = vadd.f32 %v150_v63, %v115_v60  ;;  %v236_v7 = vmul.f32 %v320_v15, %v546_v52  ;;  %347 = vtanh.f32 %v137_v55 }
  0x58   :  { %v324_v9 = vpop.eup %323  ;;  %v116_v18 = vmul.f32 %v322_v2, %v525_v35  ;;  %349 = vtanh.f32 %v180_v8 }
  0x59   :  { %v326_v10 = vpop.eup %325  ;;  %251 = vst [vmem:[#allocation11 + $0x10] sm:$0xff] %v243_v3  ;;  %v201_v12 = vadd.f32 %v193_v0, %v158_v5  ;;  %v151_v13 = vmul.f32 %v324_v9, %v529_v38  ;;  %351 = vtanh.f32 %v223_v11 }
  0x5a   :  { %v328_v22 = vpop.eup %327  ;;  %v194_v14 = vmul.f32 %v326_v10, %v543_v51 }
  0x5b   :  { %v330_v16 = vpop.eup %329  ;;  %v244_v17 = vadd.f32 %v236_v7, %v201_v12  ;;  %v159_v19 = vadd.f32 %v151_v13, %v116_v18  ;;  %v237_v20 = vmul.f32 %v328_v22, %v546_v52 }
  0x5c   :  { %v332_v21 = vpop.eup %331  ;;  %v117_v23 = vmul.f32 %v330_v16, %v525_v35 }
  0x5d   :  { %v334_v24 = vpop.eup %333  ;;  %252 = vst [vmem:[#allocation11 + $0x18] sm:$0xff] %v244_v17  ;;  %v202_v25 = vadd.f32 %v194_v14, %v159_v19  ;;  %v152_v26 = vmul.f32 %v332_v21, %v529_v38 }
  0x5e   :  { %v336_v27 = vpop.eup %335  ;;  %v195_v28 = vmul.f32 %v334_v24, %v543_v51 }
  0x5f   :  { %v338_v29 = vpop.eup %337  ;;  %v245_v30 = vadd.f32 %v237_v20, %v202_v25  ;;  %v160_v31 = vadd.f32 %v152_v26, %v117_v23  ;;  %v238_v32 = vmul.f32 %v336_v27, %v546_v52 }
  0x60   :  { %v340_v33 = vpop.eup %339  ;;  %v118_v34 = vmul.f32 %v338_v29, %v525_v35 }
  0x61   :  { %v342_v36 = vpop.eup %341  ;;  %253 = vst [vmem:[#allocation11 + $0x20] sm:$0xff] %v245_v30  ;;  %v203_v37 = vadd.f32 %v195_v28, %v160_v31  ;;  %v153_v39 = vmul.f32 %v340_v33, %v529_v38 }
  0x62   :  { %v344_v40 = vpop.eup %343  ;;  %v196_v41 = vmul.f32 %v342_v36, %v543_v51 }
  0x63   :  { %v346_v42 = vpop.eup %345  ;;  %v246_v43 = vadd.f32 %v238_v32, %v203_v37  ;;  %v161_v44 = vadd.f32 %v153_v39, %v118_v34  ;;  %v239_v45 = vmul.f32 %v344_v40, %v546_v52 }
  0x64   :  { %v348_v1 = vpop.eup %347  ;;  %v119_v46 = vmul.f32 %v346_v42, %v525_v35 }
  0x65   :  { %v350_v47 = vpop.eup %349  ;;  %254 = vst [vmem:[#allocation11 + $0x28] sm:$0xff] %v246_v43  ;;  %v204_v48 = vadd.f32 %v196_v41, %v161_v44  ;;  %v154_v49 = vmul.f32 %v348_v1, %v529_v38 }
  0x66   :  { %v352_v4 = vpop.eup %351  ;;  %v197_v50 = vmul.f32 %v350_v47, %v543_v51 }
  0x67   :  { %v247_v53 = vadd.f32 %v239_v45, %v204_v48  ;;  %v162_v54 = vadd.f32 %v154_v49, %v119_v46  ;;  %v240_v55 = vmul.f32 %v352_v4, %v546_v52 }
  0x69   :  { %255 = vst [vmem:[#allocation11 + $0x30] sm:$0xff] %v247_v53  ;;  %v205_v56 = vadd.f32 %v197_v50, %v162_v54 }
  0x6b   :  { %v248_v57 = vadd.f32 %v240_v55, %v205_v56 }
  0x6d   :  { %256 = vst [vmem:[#allocation11 + $0x38] sm:$0xff] %v248_v57 }
  0x6e   :  { %416 = shalt.err (!%p413_p5)
}
  0x6f   :  { %266 = dma.vmem_to_hbm [thread:$0]  %s264_s16, 1024, %s616_s4, [#allocation4]  }
  0x70   :  { %433 = dma.done.wait [#allocation4], 1024  }
  0x71   :  { %434 = vsyncadd [#allocation4], 4294966272 }
  0x72   :  { %270 = vsyncpa [#allocation3], 1 }
  0x73   :  { %271 = vsyncpa [#allocation4], 1 }
  0x74   :  { %272 = vsyncpa [#allocation5], 1 }
  0x75   :  { %273 = vsyncpa [#allocation6], 1 }
  0x76   :  { %274 = vsyncpa [#allocation9], 1 }

</bundles_post_ra>
